<compile_context>
chip_gen: v7x
topology: tpu7x:2x2x1
jax: 0.10.0
libtpu: 0.0.40
codegen_flags: <defaults>
</compile_context>

<pallas_src>
import jax
import jax.numpy as jnp
from jax.experimental import pallas as pl
from jax.experimental.pallas import tpu as pltpu

ACTION_DIM = 8         # stand-in for len(env.order_status)
_MAX_ROW_TILE = 4096   # rows per grid step for large batches (multiple of 8)
_SPLIT_ROWS = 2048     # single-block batches >= this split in two (v7x megacore)


def _normalize_rows(x):
    """data_normal_2d01 semantics, per row (axis=-1 reduced), f32 math.

    PyTorch reference, per row r:
      if min(r) < 0: r += abs(min(r))            (in-place shift; min becomes 0)
      m, M = min(r'), max(r'); dst = M - m
      out = (r' - m) / dst   if dst != 0 else r' / 2
    Algebraically with shift = max(0, -min(r)):
      r' - m = r - min(r),  dst = max(r) - min(r)  (one min + one max reduction).
    """
    row_min = jnp.min(x, axis=-1, keepdims=True)
    row_max = jnp.max(x, axis=-1, keepdims=True)
    shift = jnp.maximum(0.0, -row_min)
    dst = row_max - row_min
    safe = jnp.where(dst == 0.0, 1.0, dst)
    # (rows, 1) reciprocal on the EUP slot + broadcast multiply instead of a
    # full (rows, L) VPU divide.
    inv = pl.reciprocal(safe, approx=False)
    norm = (x - row_min) * inv
    # dst == 0 branch divides the *shifted* row by 2 (orign_data was already
    # modified in place before that branch in the PyTorch code).
    return jnp.where(dst == 0.0, (x + shift) * 0.5, norm)


def _fused_policy_kernel(x0_ref, x1_ref, x2_ref, w_ref, b_ref, o_ref):
    """normalize(x0|x1|x2) -> lane concat -> single K=3L matmul, all in VMEM."""
    feats = jnp.concatenate(
        [_normalize_rows(x0_ref[...]),
         _normalize_rows(x1_ref[...]),
         _normalize_rows(x2_ref[...])],
        axis=-1)                                        # (tr, 3L), lane axis
    out = jnp.dot(feats, w_ref[...], preferred_element_type=jnp.float32)
    o_ref[...] = (out + b_ref[...]).astype(o_ref.dtype)


@jax.jit
def policy_net_forward(x0, x1, x2, k, w, b):
    # PyTorch: if x0.size(0) == 4 -> add batch dim.
    if x0.shape[0] == 4:
        x0, x1, x2 = x0[None], x1[None], x2[None]

    # TODO(synk): env.upmask(x2, k) — environment-specific in-place mask update; Vrp_Env not provided.
    del k

    B, C, L = x0.shape
    N = w.shape[-1]
    R = B * C

    # 2-D [rows, features] slabs; feature axis -> TPU lanes.
    x0r = x0.reshape(R, L).astype(jnp.float32)
    x1r = x1.reshape(R, L).astype(jnp.float32)
    x2r = x2.reshape(R, L).astype(jnp.float32)
    # Weight for the (implicitly) concatenated features, kept as a single
    # (3L, N) resident block; prepared once here so the kernel never re-casts
    # or re-shapes it per grid step.  Rows [0:L)->x0, [L:2L)->x1, [2L:3L)->x2.
    w2 = w.reshape(3 * L, N).astype(jnp.float32)
    b2 = b.reshape(1, N).astype(jnp.float32)

    # Row tiling:
    #   tiny batches  -> single full-array block (layout-legal, no padding)
    #   mid batches   -> split into two parallel steps (both v7x TensorCores)
    #   large batches -> 4096-row tiles, zero-padded ragged tail
    if R <= _MAX_ROW_TILE:
        r_pad = R
        if R >= _SPLIT_ROWS and R % 16 == 0:
            tr = R // 2
        else:
            tr = R
    else:
        tr = _MAX_ROW_TILE
        r_pad = pl.cdiv(R, tr) * tr
    if r_pad != R:
        # TODO(synk): the pad round-trips the inputs through HBM once; only hit
        # when R exceeds and is not a multiple of the 4096-row tile.
        pad = ((0, r_pad - R), (0, 0))
        x0r, x1r, x2r = (jnp.pad(a, pad) for a in (x0r, x1r, x2r))
    grid = (r_pad // tr,)

    cost = pl.CostEstimate(
        flops=2 * r_pad * 3 * L * N + 12 * r_pad * 3 * L,
        transcendentals=r_pad * 3,                       # per-row reciprocal
        bytes_accessed=4 * (3 * r_pad * L + 3 * L * N + N + r_pad * N),
    )

    row_spec = pl.BlockSpec((tr, L), lambda i: (i, 0))
    out = pl.pallas_call(
        _fused_policy_kernel,
        out_shape=jax.ShapeDtypeStruct((r_pad, N), jnp.float32),
        grid_spec=pltpu.PrefetchScalarGridSpec(
            num_scalar_prefetch=0,
            grid=grid,
            in_specs=[
                row_spec,                                       # x0 rows
                row_spec,                                       # x1 rows
                row_spec,                                       # x2 rows
                pl.BlockSpec((3 * L, N), lambda i: (0, 0)),     # resident weight
                pl.BlockSpec((1, N), lambda i: (0, 0)),         # resident bias
            ],
            out_specs=pl.BlockSpec((tr, N), lambda i: (i, 0)),
        ),
        compiler_params=pltpu.CompilerParams(
            dimension_semantics=("parallel",),
            vmem_limit_bytes=32 * 1024 * 1024,   # stays under v7x's 64 MiB VMEM
        ),
        cost_estimate=cost,
    )(x0r, x1r, x2r, w2, b2)

    # out = out.view(-1, action_dim)
    return out[:R].reshape(-1, N)


if __name__ == "__main__":
    key = jax.random.PRNGKey(0)
    k0, k1, k2, kw = jax.random.split(key, 4)

    C, L = 4, 16  # unbatched inputs are (4, L) -> unsqueezed to (1, 4, L)
    x0 = jax.random.normal(k0, (C, L), dtype=jnp.float32)   # mixed-sign rows
    x1 = jax.random.normal(k1, (C, L), dtype=jnp.float32)
    x2 = jax.random.uniform(k2, (C, L), dtype=jnp.float32)
    kk = 1

    w = 0.02 * jax.random.normal(kw, (3 * L, ACTION_DIM), dtype=jnp.float32)
    b = jnp.zeros((1, ACTION_DIM), dtype=jnp.float32)

    out = policy_net_forward(x0, x1, x2, kk, w, b)
    jax.block_until_ready(out)
    assert out.shape == (C, ACTION_DIM)

    # Pure-JAX reference of the same math (normalize + concat + linear head).
    def _ref_norm(x):
        mn = x.min(axis=-1, keepdims=True)
        mx = x.max(axis=-1, keepdims=True)
        shift = jnp.maximum(0.0, -mn)
        dst = mx - mn
        return jnp.where(dst == 0.0, (x + shift) * 0.5,
                         (x - mn) / jnp.where(dst == 0.0, 1.0, dst))

    feats = jnp.concatenate([_ref_norm(x0), _ref_norm(x1), _ref_norm(x2)], axis=-1)
    ref = feats @ w + b
    assert float(jnp.max(jnp.abs(out - ref))) < 2e-3  # f32 operands -> tight tol

    print("KERNEL_OK")
</pallas_src>

<mosaic_0001>
module attributes {stable_mosaic.version = 11 : i64} {
  func.func @_fused_policy_kernel(%arg0: i32, %arg1: memref<4x16xf32, #tpu.memory_space<vmem>>, %arg2: memref<4x16xf32, #tpu.memory_space<vmem>>, %arg3: memref<4x16xf32, #tpu.memory_space<vmem>>, %arg4: memref<48x8xf32, #tpu.memory_space<vmem>>, %arg5: memref<1x8xf32, #tpu.memory_space<vmem>>, %arg6: memref<4x8xf32, #tpu.memory_space<vmem>>) attributes {dimension_semantics = [#tpu.dimension_semantics<parallel>], iteration_bounds = array<i64: 1>, scalar_prefetch = 0 : i64, scratch_operands = 0 : i64, tpu.core_type = #tpu.core_type<tc>, window_params = [{transform_indices = @transform_0, window_bounds = array<i64: 4, 16>}, {transform_indices = @transform_1, window_bounds = array<i64: 4, 16>}, {transform_indices = @transform_2, window_bounds = array<i64: 4, 16>}, {pipeline_mode = #tpu.pipeline_mode<synchronous>, transform_indices = @transform_3, window_bounds = array<i64: 48, 8>}, {pipeline_mode = #tpu.pipeline_mode<synchronous>, transform_indices = @transform_4, window_bounds = array<i64: 1, 8>}, {transform_indices = @transform_5, window_bounds = array<i64: 4, 8>}]} {
    %c0 = arith.constant 0 : index
    %c0_0 = arith.constant 0 : index
    %0 = vector.load %arg1[%c0, %c0_0] : memref<4x16xf32, #tpu.memory_space<vmem>>, vector<4x16xf32>
    %cst = arith.constant dense<0x7F800000> : vector<4xf32>
    %1 = vector.multi_reduction <minimumf>, %0, %cst [1] : vector<4x16xf32> to vector<4xf32>
    %2 = vector.shape_cast %1 : vector<4xf32> to vector<4x1xf32>
    %cst_1 = arith.constant dense<0xFF800000> : vector<4xf32>
    %3 = vector.multi_reduction <maximumf>, %0, %cst_1 [1] : vector<4x16xf32> to vector<4xf32>
    %4 = vector.shape_cast %3 : vector<4xf32> to vector<4x1xf32>
    %cst_2 = arith.constant 0.000000e+00 : f32
    %5 = vector.broadcast %cst_2 : f32 to vector<4x1xf32>
    %6 = arith.subf %5, %2 : vector<4x1xf32>
    %cst_3 = arith.constant 0.000000e+00 : f32
    %7 = vector.broadcast %cst_3 : f32 to vector<4x1xf32>
    %8 = arith.maximumf %7, %6 : vector<4x1xf32>
    %9 = arith.subf %4, %2 : vector<4x1xf32>
    %cst_4 = arith.constant 0.000000e+00 : f32
    %10 = vector.broadcast %cst_4 : f32 to vector<4x1xf32>
    %11 = arith.cmpf oeq, %9, %10 : vector<4x1xf32>
    %cst_5 = arith.constant 1.000000e+00 : f32
    %12 = vector.broadcast %cst_5 : f32 to vector<4x1xf32>
    %13 = arith.select %11, %12, %9 : vector<4x1xi1>, vector<4x1xf32>
    %14 = tpu.reciprocal %13 : vector<4x1xf32> -> vector<4x1xf32>
    %15 = vector.broadcast %2 : vector<4x1xf32> to vector<4x16xf32>
    %16 = arith.subf %0, %15 : vector<4x16xf32>
    %17 = vector.broadcast %14 : vector<4x1xf32> to vector<4x16xf32>
    %18 = arith.mulf %16, %17 : vector<4x16xf32>
    %cst_6 = arith.constant 0.000000e+00 : f32
    %19 = vector.broadcast %cst_6 : f32 to vector<4x1xf32>
    %20 = arith.cmpf oeq, %9, %19 : vector<4x1xf32>
    %21 = vector.broadcast %8 : vector<4x1xf32> to vector<4x16xf32>
    %22 = arith.addf %0, %21 : vector<4x16xf32>
    %cst_7 = arith.constant 5.000000e-01 : f32
    %23 = vector.broadcast %cst_7 : f32 to vector<4x16xf32>
    %24 = arith.mulf %22, %23 : vector<4x16xf32>
    %25 = vector.shape_cast %20 : vector<4x1xi1> to vector<4x1xi1>
    %26 = vector.broadcast %25 : vector<4x1xi1> to vector<4x16xi1>
    %27 = arith.select %26, %24, %18 : vector<4x16xi1>, vector<4x16xf32>
    %c0_8 = arith.constant 0 : index
    %c0_9 = arith.constant 0 : index
    %28 = vector.load %arg2[%c0_8, %c0_9] : memref<4x16xf32, #tpu.memory_space<vmem>>, vector<4x16xf32>
    %cst_10 = arith.constant dense<0x7F800000> : vector<4xf32>
    %29 = vector.multi_reduction <minimumf>, %28, %cst_10 [1] : vector<4x16xf32> to vector<4xf32>
    %30 = vector.shape_cast %29 : vector<4xf32> to vector<4x1xf32>
    %cst_11 = arith.constant dense<0xFF800000> : vector<4xf32>
    %31 = vector.multi_reduction <maximumf>, %28, %cst_11 [1] : vector<4x16xf32> to vector<4xf32>
    %32 = vector.shape_cast %31 : vector<4xf32> to vector<4x1xf32>
    %cst_12 = arith.constant 0.000000e+00 : f32
    %33 = vector.broadcast %cst_12 : f32 to vector<4x1xf32>
    %34 = arith.subf %33, %30 : vector<4x1xf32>
    %cst_13 = arith.constant 0.000000e+00 : f32
    %35 = vector.broadcast %cst_13 : f32 to vector<4x1xf32>
    %36 = arith.maximumf %35, %34 : vector<4x1xf32>
    %37 = arith.subf %32, %30 : vector<4x1xf32>
    %cst_14 = arith.constant 0.000000e+00 : f32
    %38 = vector.broadcast %cst_14 : f32 to vector<4x1xf32>
    %39 = arith.cmpf oeq, %37, %38 : vector<4x1xf32>
    %cst_15 = arith.constant 1.000000e+00 : f32
    %40 = vector.broadcast %cst_15 : f32 to vector<4x1xf32>
    %41 = arith.select %39, %40, %37 : vector<4x1xi1>, vector<4x1xf32>
    %42 = tpu.reciprocal %41 : vector<4x1xf32> -> vector<4x1xf32>
    %43 = vector.broadcast %30 : vector<4x1xf32> to vector<4x16xf32>
    %44 = arith.subf %28, %43 : vector<4x16xf32>
    %45 = vector.broadcast %42 : vector<4x1xf32> to vector<4x16xf32>
    %46 = arith.mulf %44, %45 : vector<4x16xf32>
    %cst_16 = arith.constant 0.000000e+00 : f32
    %47 = vector.broadcast %cst_16 : f32 to vector<4x1xf32>
    %48 = arith.cmpf oeq, %37, %47 : vector<4x1xf32>
    %49 = vector.broadcast %36 : vector<4x1xf32> to vector<4x16xf32>
    %50 = arith.addf %28, %49 : vector<4x16xf32>
    %cst_17 = arith.constant 5.000000e-01 : f32
    %51 = vector.broadcast %cst_17 : f32 to vector<4x16xf32>
    %52 = arith.mulf %50, %51 : vector<4x16xf32>
    %53 = vector.shape_cast %48 : vector<4x1xi1> to vector<4x1xi1>
    %54 = vector.broadcast %53 : vector<4x1xi1> to vector<4x16xi1>
    %55 = arith.select %54, %52, %46 : vector<4x16xi1>, vector<4x16xf32>
    %c0_18 = arith.constant 0 : index
    %c0_19 = arith.constant 0 : index
    %56 = vector.load %arg3[%c0_18, %c0_19] : memref<4x16xf32, #tpu.memory_space<vmem>>, vector<4x16xf32>
    %cst_20 = arith.constant dense<0x7F800000> : vector<4xf32>
    %57 = vector.multi_reduction <minimumf>, %56, %cst_20 [1] : vector<4x16xf32> to vector<4xf32>
    %58 = vector.shape_cast %57 : vector<4xf32> to vector<4x1xf32>
    %cst_21 = arith.constant dense<0xFF800000> : vector<4xf32>
    %59 = vector.multi_reduction <maximumf>, %56, %cst_21 [1] : vector<4x16xf32> to vector<4xf32>
    %60 = vector.shape_cast %59 : vector<4xf32> to vector<4x1xf32>
    %cst_22 = arith.constant 0.000000e+00 : f32
    %61 = vector.broadcast %cst_22 : f32 to vector<4x1xf32>
    %62 = arith.subf %61, %58 : vector<4x1xf32>
    %cst_23 = arith.constant 0.000000e+00 : f32
    %63 = vector.broadcast %cst_23 : f32 to vector<4x1xf32>
    %64 = arith.maximumf %63, %62 : vector<4x1xf32>
    %65 = arith.subf %60, %58 : vector<4x1xf32>
    %cst_24 = arith.constant 0.000000e+00 : f32
    %66 = vector.broadcast %cst_24 : f32 to vector<4x1xf32>
    %67 = arith.cmpf oeq, %65, %66 : vector<4x1xf32>
    %cst_25 = arith.constant 1.000000e+00 : f32
    %68 = vector.broadcast %cst_25 : f32 to vector<4x1xf32>
    %69 = arith.select %67, %68, %65 : vector<4x1xi1>, vector<4x1xf32>
    %70 = tpu.reciprocal %69 : vector<4x1xf32> -> vector<4x1xf32>
    %71 = vector.broadcast %58 : vector<4x1xf32> to vector<4x16xf32>
    %72 = arith.subf %56, %71 : vector<4x16xf32>
    %73 = vector.broadcast %70 : vector<4x1xf32> to vector<4x16xf32>
    %74 = arith.mulf %72, %73 : vector<4x16xf32>
    %cst_26 = arith.constant 0.000000e+00 : f32
    %75 = vector.broadcast %cst_26 : f32 to vector<4x1xf32>
    %76 = arith.cmpf oeq, %65, %75 : vector<4x1xf32>
    %77 = vector.broadcast %64 : vector<4x1xf32> to vector<4x16xf32>
    %78 = arith.addf %56, %77 : vector<4x16xf32>
    %cst_27 = arith.constant 5.000000e-01 : f32
    %79 = vector.broadcast %cst_27 : f32 to vector<4x16xf32>
    %80 = arith.mulf %78, %79 : vector<4x16xf32>
    %81 = vector.shape_cast %76 : vector<4x1xi1> to vector<4x1xi1>
    %82 = vector.broadcast %81 : vector<4x1xi1> to vector<4x16xi1>
    %83 = arith.select %82, %80, %74 : vector<4x16xi1>, vector<4x16xf32>
    %84 = tpu.concatenate %27, %55, %83 in 1 : vector<4x16xf32>, vector<4x16xf32>, vector<4x16xf32> -> vector<4x48xf32>
    %c0_28 = arith.constant 0 : index
    %c0_29 = arith.constant 0 : index
    %85 = vector.load %arg4[%c0_28, %c0_29] : memref<48x8xf32, #tpu.memory_space<vmem>>, vector<48x8xf32>
    %cst_30 = arith.constant dense<0.000000e+00> : vector<4x8xf32>
    %86 = tpu.matmul %84, %85, %cst_30 {dimension_numbers = #tpu.dot_dimension_numbers<[1], [0], [0], [1], [0, 0, 1, 1], [], []>} : vector<4x48xf32>, vector<48x8xf32>, vector<4x8xf32> -> vector<4x8xf32>
    %c0_31 = arith.constant 0 : index
    %c0_32 = arith.constant 0 : index
    %87 = vector.load %arg5[%c0_31, %c0_32] : memref<1x8xf32, #tpu.memory_space<vmem>>, vector<1x8xf32>
    %88 = vector.broadcast %87 : vector<1x8xf32> to vector<4x8xf32>
    %89 = arith.addf %86, %88 : vector<4x8xf32>
    %c0_33 = arith.constant 0 : index
    %c0_34 = arith.constant 0 : index
    %90 = vector.load %arg6[%c0_33, %c0_34] : memref<4x8xf32, #tpu.memory_space<vmem>>, vector<4x8xf32>
    tpu.vector_store %arg6[%c0_33, %c0_34], %89 {strides = array<i32>} : memref<4x8xf32, #tpu.memory_space<vmem>>, vector<4x8xf32>,
    return
  }
  func.func @transform_0(%arg0: i32) -> (i32, i32) {
    %c0_i32 = arith.constant 0 : i32
    %c0_i32_0 = arith.constant 0 : i32
    return %arg0, %c0_i32 : i32, i32
  }
  func.func @transform_1(%arg0: i32) -> (i32, i32) {
    %c0_i32 = arith.constant 0 : i32
    %c0_i32_0 = arith.constant 0 : i32
    return %arg0, %c0_i32 : i32, i32
  }
  func.func @transform_2(%arg0: i32) -> (i32, i32) {
    %c0_i32 = arith.constant 0 : i32
    %c0_i32_0 = arith.constant 0 : i32
    return %arg0, %c0_i32 : i32, i32
  }
  func.func @transform_3(%arg0: i32) -> (i32, i32) {
    %c0_i32 = arith.constant 0 : i32
    %c0_i32_0 = arith.constant 0 : i32
    %c0_i32_1 = arith.constant 0 : i32
    return %c0_i32, %c0_i32_0 : i32, i32
  }
  func.func @transform_4(%arg0: i32) -> (i32, i32) {
    %c0_i32 = arith.constant 0 : i32
    %c0_i32_0 = arith.constant 0 : i32
    %c0_i32_1 = arith.constant 0 : i32
    return %c0_i32, %c0_i32_0 : i32, i32
  }
  func.func @transform_5(%arg0: i32) -> (i32, i32) {
    %c0_i32 = arith.constant 0 : i32
    %c0_i32_0 = arith.constant 0 : i32
    return %arg0, %c0_i32 : i32, i32
  }
}

</mosaic_0001>

<bundles_post_ra>
// kernel: policy_net_forward.1
= control target key start
LH: loop header
LB: loop body
LE: loop exit
PB: predicated region body
PF: predicated region fallthrough
CT: control target
= control target key end

     0   :  { %vm22_vm0 = vcmask 125952   ;;  %s354_s0 = inlined_call_operand.vmem [shape: f32[4,16], index: 0, kind: input, shape index: {}]   ;;  %s355_s1 = inlined_call_operand.vmem [shape: f32[4,16], index: 1, kind: input, shape index: {}]   ;;  %s356_s2 = inlined_call_operand.vmem [shape: f32[4,16], index: 2, kind: input, shape index: {}]   ;;  %s357_s3 = inlined_call_operand.vmem [shape: f32[48,8], index: 3, kind: input, shape index: {}]   ;;  %s358_s4 = inlined_call_operand.vmem [shape: f32[1,8], index: 4, kind: input, shape index: {}]   ;;  %s359_s5 = inlined_call_operand.hbm [shape: f32[4,8], index: 5, kind: output, shape index: {}]  }
   0x1   :  { %v62_v0 = vld [vmem:[%s356_s2] sm:$0xf] }
   0x2   :  { %v42_v1 = vld [vmem:[%s355_s1] sm:$0xf]  ;;  %v63_v2 = vsel %vm22_vm0, %v62_v0, inf }
   0x3   :  { %v43_v3 = vsel %vm22_vm0, %v42_v1, inf  ;;  %64 = vmin.xlane.f32.xlu1 %v63_v2 }
   0x4   :  { %44 = vmin.xlane.f32.xlu0 %v43_v3 }
   0x5   :  { %10 = vsyncpa [#allocation3], 0  ;;  %v66_v4 = vsel %vm22_vm0, %v62_v0, -inf  ;;  %v46_v5 = vsel %vm22_vm0, %v42_v1, -inf  ;;  %v311_v6 = vld [vmem:[%s354_s0] sm:$0xf] }
   0x6   :  { %v26_v7 = vsel %vm22_vm0, %v311_v6, -inf  ;;  %v23_v8 = vsel %vm22_vm0, %v311_v6, inf  ;;  %v94_v9 = vld [vmem:[%s357_s3] sm:$0xff]  ;;  %v95_v10 = vld [vmem:[%s357_s3 + $0x8] sm:$0xff]  ;;  %v96_v11 = vld [vmem:[%s357_s3 + $0x10] sm:$0xff]  ;;  %v266_v12 = vmov 0.0|0.0  }
   0x7   :  { %67 = vmax.xlane.f32.xlu1 %v66_v4  ;;  %221 = vmatprep.subr.bf16.mxu0 %v266_v12  ;;  %v222_v13 = vpack.c.bf16 %v95_v10, %v94_v9  ;;  %v97_v14 = vld [vmem:[%s357_s3 + $0x18] sm:$0xff]  ;;  %v98_v16 = vld [vmem:[%s357_s3 + $0x20] sm:$0xff]  ;;  %v99_v17 = vld [vmem:[%s357_s3 + $0x28] sm:$0xff]  ;;  %vm267_vm3 = vmmov 0   ;;  %v268_v30 = vmov 0.0   ;;  %s269_s3 = smov 32  }
   0x8   :  { %47 = vmax.xlane.f32.xlu0 %v46_v5  ;;  %v225_v15 = vpack.c.bf16 %v97_v14, %v96_v11  ;;  %v228_v18 = vpack.c.bf16 %v99_v17, %v98_v16  ;;  %218 = vmatprep.mubr.msk.f32.mxu0 %vm267_vm3, %v268_v30  ;;  %s270_s8 = smov 16   ;;  %vm90_vm5 = vcmask 130048   ;;  %vm92_vm6 = vcmask 261120   ;;  %v197_v60 = vld [vmem:[%s358_s4] ss:$0 sm:$0xff]  ;;  %s271_s11 = smov [#allocation2]  }
   0x9   :  { %223 = vmatpush3.bf16.msra.mxu0 %v222_v13  ;;  %vm107_vm7 = vcmask 392192   ;;  %s189_s12 = sshll.u32 %s271_s11, 4  ;;  %vm181_vm8 = vcmask 60416   ;;  %s190_s12 = int_to_ptr.vmem [resolvable:$true] %s189_s12 }
   0xa   :  { %224 = vmatprep.subr.bf16.mxu0 %v266_v12  ;;  %s242_s13 = scalar_lea.vmem %s190_s12, 64  ;;  %p247_p1 = scmp.lt.s32.totalorder %s190_s12, %s190_s12 }
   0xb   :  { %27 = vmax.xlane.f32.xlu1 %v26_v7  ;;  %p243_p0 = scmp.ne.s32.totalorder %s190_s12, %s242_s13  ;;  %p248_p2 = scmp.lt.s32.totalorder %s242_s13, %s242_s13 }
   0xc   :  { %24 = vmin.xlane.f32.xlu0 %v23_v8 }
   0xd   :  { %226 = vmatpush3.bf16.msra.mxu0 %v225_v15  ;;  %p249_p3 = por %p248_p2, %p247_p1 }
   0xe   :  { %227 = vmatprep.subr.bf16.mxu0 %v266_v12 }
   0xf   :  { %p250_p4 = pnand %p249_p3, %p243_p0 }
  0x11   :  { %229 = vmatpush3.bf16.msra.mxu0 %v228_v18 }
  0x90   :  { %v65_v19 = vpop.xlane.xlu1 %64 }
  0x91   :  { %v45_v20 = vpop.xlane.xlu0 %44  ;;  %v69_v25 = vsub.f32 0.0, %v65_v19  ;;  %v75_v34 = vsub.f32 %v62_v0, %v65_v19 }
  0x92   :  { %v49_v28 = vsub.f32 0.0, %v45_v20  ;;  %v55_v36 = vsub.f32 %v42_v1, %v45_v20 }
  0x93   :  { %v70_v29 = vmax.f32 %v69_v25, 0.0 }
  0x94   :  { %v68_v21 = vpop.xlane.xlu1 %67  ;;  %v50_v31 = vmax.f32 %v49_v28, 0.0 }
  0x95   :  { %v48_v22 = vpop.xlane.xlu0 %47  ;;  %v71_v23 = vsub.f32 %v68_v21, %v65_v19  ;;  %v77_v32 = vadd.f32 %v70_v29, %v62_v0 }
  0x96   :  { %v51_v24 = vsub.f32 %v48_v22, %v45_v20  ;;  %v57_v33 = vadd.f32 %v50_v31, %v42_v1 }
  0x97   :  { %vm72_vm1 = vcmp.eq.f32.partialorder %v71_v23, 0.0  ;;  %v78_v39 = vmul.f32 0.5, %v77_v32 }
  0x98   :  { %vm52_vm2 = vcmp.eq.f32.partialorder %v51_v24, 0.0  ;;  %v73_v26 = vsel %vm72_vm1, 1.0, %v71_v23  ;;  %v58_v41 = vmul.f32 0.5, %v57_v33  ;;  %v28_v44 = vpop.xlane.xlu1 %27 }
  0x99   :  { %v53_v27 = vsel %vm52_vm2, 1.0, %v51_v24  ;;  %236 = vrcp.f32 %v73_v26  ;;  %v25_v45 = vpop.xlane.xlu0 %24 }
  0x9a   :  { %238 = vrcp.f32 %v53_v27  ;;  %v31_v46 = vsub.f32 %v28_v44, %v25_v45  ;;  %v29_v48 = vsub.f32 0.0, %v25_v45  ;;  %v35_v50 = vsub.f32 %v311_v6, %v25_v45 }
  0x9c   :  { %vm32_vm4 = vcmp.eq.f32.partialorder %v31_v46, 0.0  ;;  %v30_v49 = vmax.f32 %v29_v48, 0.0 }
  0x9d   :  { %v33_v47 = vsel %vm32_vm4, 1.0, %v31_v46 }
  0x9e   :  { %240 = vrcp.f32 %v33_v47  ;;  %v37_v51 = vadd.f32 %v30_v49, %v311_v6 }
  0xa0   :  { %v38_v54 = vmul.f32 0.5, %v37_v51 }
  0xa3   :  { %v237_v35 = vpop.eup %236 }
  0xa4   :  { %v239_v37 = vpop.eup %238  ;;  %v76_v38 = vmul.f32 %v237_v35, %v75_v34 }
  0xa5   :  { %v56_v40 = vmul.f32 %v239_v37, %v55_v36 }
  0xa6   :  { %v81_v42 = vsel %vm72_vm1, %v78_v39, %v76_v38 }
  0xa7   :  { %87 = vrot.lane.b32.xlu1 %v81_v42, %s269_s3  ;;  %v61_v43 = vsel %vm52_vm2, %v58_v41, %v56_v40 }
  0xa8   :  { %83 = vrot.lane.b32.xlu0 %v61_v43, %s270_s8  ;;  %v241_v52 = vpop.eup %240 }
  0xa9   :  { %v36_v53 = vmul.f32 %v241_v52, %v35_v50 }
  0xab   :  { %v41_v56 = vsel %vm32_vm4, %v38_v54, %v36_v53 }
 0x119   :  { %v88_v55 = vpop.permute.xlu1 %87 }
 0x11a   :  { %v84_v57 = vpop.permute.xlu0 %83 }
 0x11b   :  { %v91_v58 = vsel %vm90_vm5, %v41_v56, %v84_v57 }
 0x11c   :  { %v93_v59 = vsel %vm92_vm6, %v91_v58, %v88_v55 }
 0x11d   :  { %219 = vmatmul.mubr.msk.f32.vlgmr.msra.gmra.mrb[0].mxu0 %vm107_vm7, %v93_v59 }
 0x1f0   :  { %v177_v61 = vpop.f32.mrb[0].mxu0 }
 0x1f1   :  { %v178_v62 = vadd.f32 %v197_v60, %v177_v61  ;;  %v220_v63 = vpop.f32.mrb[1].mxu0 }
 0x1f3   :  { %182 = vst.msk [vmem:[#allocation2] sm:$0xf] %vm181_vm8, %v178_v62 }
 0x1f4   :  { %253 = shalt.err (!%p250_p4)
}
 0x1f5   :  { %s254_s16 = scalar_lea.hbm %s359_s5, 64 }
 0x1f6   :  { %p255_p5 = scmp.ne.s32.totalorder %s359_s5, %s254_s16  ;;  %p258_p6 = scmp.lt.u32.totalorder %s254_s16, %s359_s5 }
 0x1f8   :  { %p260_p7 = pnand %p258_p6, %p255_p5 }
 0x1fa   :  { %263 = shalt.err (!%p260_p7)
}
 0x1fb   :  { %192 = dma.vmem_to_hbm [thread:$0]  %s190_s12, 64, %s359_s5, [#allocation3]  }
 0x1fc   :  { %264 = dma.done.wait [#allocation3], 64  }
 0x1fd   :  { %265 = vsyncadd [#allocation3], 4294967232 }
 0x1fe   :  { %196 = vsyncpa [#allocation3], 1 }

</bundles_post_ra>
